<compile_context>
chip_gen: v5e
topology: v5e:2x2
jax: 0.10.0
libtpu: 0.0.40
codegen_flags: <defaults>
</compile_context>

<pallas_src>
import jax
import jax.numpy as jnp
from jax.experimental import pallas as pl
from jax.experimental.pallas import tpu as pltpu

EPS = 1e-5


def _round_up(x, m):
    return ((x + m - 1) // m) * m


# --------------------------------------------------------------------------
# Kernel
# --------------------------------------------------------------------------
def _complex_projection_kernel(
    img_ref, txt_ref, conj_ref,
    iw1_ref, ib1_ref, iw2_ref, ib2_ref,
    tw1_ref, tb1_ref, tw2_ref, tb2_ref,
    concat_ref, x1_ref, x2_ref,
):
    mm_dtype = iw1_ref.dtype  # bf16 (default) or f32 matmul operands

    # ---- img branch: (eval-mode BN folded into iw1/ib1) -> Linear -> ReLU -> Linear
    h = jnp.dot(img_ref[...].astype(mm_dtype), iw1_ref[...],
                preferred_element_type=jnp.float32) + ib1_ref[...]
    h = jnp.maximum(h, 0.0).astype(mm_dtype)
    x1 = jnp.dot(h, iw2_ref[...],
                 preferred_element_type=jnp.float32) + ib2_ref[...]

    # ---- text (bert) branch: (BN folded) -> Linear -> ReLU -> Linear
    g = jnp.dot(txt_ref[...].astype(mm_dtype), tw1_ref[...],
                preferred_element_type=jnp.float32) + tb1_ref[...]
    g = jnp.maximum(g, 0.0).astype(mm_dtype)
    x2 = jnp.dot(g, tw2_ref[...],
                 preferred_element_type=jnp.float32) + tb2_ref[...]

    x1_ref[...] = x1.astype(x1_ref.dtype)
    x2_ref[...] = x2.astype(x2_ref.dtype)

    # ---- complex projection tail: write re/im once, directly into the
    # lane-dense concat slab (re | im). conj is a (TN, 1) broadcast column.
    # d is a multiple of 128 for module defaults (384): both halves of the
    # concat store are lane-aligned (unmasked vst).
    # TODO(synk): on v7x the f32 cos/sin polynomial tail becomes the binding
    # VALU work once the 3.2 TB/s HBM stops being the limiter; sharing one
    # range reduction between cos and sin would roughly halve it. On v5e/v6e
    # it hides entirely under DMA, so it is left as plain jnp.cos/jnp.sin.
    d = x1.shape[-1]
    concat_ref[:, :d] = (x1 * jnp.cos(x2)).astype(concat_ref.dtype)
    concat_ref[:, d:] = ((x1 * conj_ref[...]) * jnp.sin(x2)).astype(concat_ref.dtype)


# --------------------------------------------------------------------------
# Parameter folding (eval-mode BN composed into the first Linear)
# --------------------------------------------------------------------------
def _fold_bn_into_linear(gamma, beta, mean, var, w1, b1):
    scale = gamma * jax.lax.rsqrt(var + EPS)        # (1, Din)
    shift = beta - mean * scale                     # (1, Din)
    w1_folded = w1 * scale[0][:, None]              # scale rows of (Din, Dout)
    b1_folded = b1 + shift @ w1                     # (1, Dout)
    return w1_folded, b1_folded


def fold_params(params, mm_dtype):
    iw1, ib1 = _fold_bn_into_linear(
        params["img_bn_gamma"], params["img_bn_beta"],
        params["img_bn_mean"], params["img_bn_var"],
        params["img_w1"], params["img_b1"])
    tw1, tb1 = _fold_bn_into_linear(
        params["txt_bn_gamma"], params["txt_bn_beta"],
        params["txt_bn_mean"], params["txt_bn_var"],
        params["txt_w1"], params["txt_b1"])
    return dict(
        iw1=iw1.astype(mm_dtype), ib1=ib1.astype(jnp.float32),
        iw2=params["img_w2"].astype(mm_dtype), ib2=params["img_b2"].astype(jnp.float32),
        tw1=tw1.astype(mm_dtype), tb1=tb1.astype(jnp.float32),
        tw2=params["txt_w2"].astype(mm_dtype), tb2=params["txt_b2"].astype(jnp.float32),
    )


# --------------------------------------------------------------------------
# Tile selection
# --------------------------------------------------------------------------
def _choose_tile_n(n, tile_n):
    """Batch tile: large tiles amortize the ~0.35 us per-grid-step overhead
    (the kernel is HBM-bound), but keep >=2 grid steps once N > 256 so the
    "parallel" batch axis can shard across both TensorCores on v7x."""
    tile_n = max(int(tile_n), 1)
    if n <= 256:
        tn = min(n, tile_n)
    else:
        tn = min(tile_n, _round_up(pl.cdiv(n, 2), 256))
    if tn != n:
        # Block's second-minor dim must be a multiple of 8 (or the full extent).
        tn = max(8, (tn // 8) * 8)
    return tn


# --------------------------------------------------------------------------
# Wrapper
# --------------------------------------------------------------------------
def complex_projection(img, txt, conj, params, *, use_bf16_matmul=True,
                       tile_n=1024, out_dtype=jnp.float32):
    """img: (N, Di), txt: (N, Dt), conj: (>=N, 1). Returns the torch module's 6-tuple."""
    N, Di = img.shape
    Nt, Dt = txt.shape
    assert N == Nt, (N, Nt)
    assert conj.ndim == 2 and conj.shape[1] == 1 and conj.shape[0] >= N, conj.shape
    conj = conj[:N].astype(jnp.float32)             # CONJUGATE[:num_samples]

    mm_dtype = jnp.bfloat16 if use_bf16_matmul else jnp.float32
    p = fold_params(params, mm_dtype)

    TN = _choose_tile_n(N, tile_n)
    grid = (pl.cdiv(N, TN),)

    row = lambda d: pl.BlockSpec((TN, d), lambda i: (i, 0))          # batch-tiled
    # Constant block index -> DMA'd once (first step), resident thereafter.
    res = lambda a: pl.BlockSpec(a.shape, lambda i: (0, 0))

    in_specs = [
        row(Di), row(Dt), row(1),
        res(p["iw1"]), res(p["ib1"]), res(p["iw2"]), res(p["ib2"]),
        res(p["tw1"]), res(p["tb1"]), res(p["tw2"]), res(p["tb2"]),
    ]
    out_specs = (row(2 * Di), row(Di), row(Di))
    out_shapes = (
        jax.ShapeDtypeStruct((N, 2 * Di), out_dtype),   # concat_x (re | im)
        jax.ShapeDtypeStruct((N, Di), out_dtype),       # x1
        jax.ShapeDtypeStruct((N, Di), out_dtype),       # x2
    )

    # VMEM budget: double-buffered tile I/O + double-buffered resident params,
    # capped at 48 MiB to leave headroom on v7x (64 MiB/TC).
    out_itemsize = jnp.dtype(out_dtype).itemsize
    w_bytes = sum(int(v.size) * v.dtype.itemsize for v in p.values())
    tile_io_bytes = TN * ((Di + Dt + 1) * 4 + 4 * Di * out_itemsize)
    vmem_limit = int(min(48 << 20,
                         max(32 << 20, 2 * tile_io_bytes + 2 * w_bytes + (4 << 20))))

    cost = pl.CostEstimate(
        flops=2 * N * (3 * Di * Di + Dt * Di),
        transcendentals=2 * N * Di,                       # cos + sin
        bytes_accessed=int(N * (Di + Dt + 1) * 4          # inputs (weights counted once:
                           + w_bytes                      #  constant-index, no re-DMA)
                           + N * 4 * Di * out_itemsize),  # concat + x1 + x2
    )

    concat_x, x1, x2 = pl.pallas_call(
        _complex_projection_kernel,
        out_shape=out_shapes,
        grid=grid,
        in_specs=in_specs,
        out_specs=out_specs,
        compiler_params=pltpu.CompilerParams(
            dimension_semantics=("parallel",),
            vmem_limit_bytes=vmem_limit,
        ),
        cost_estimate=cost,
    )(img, txt, conj,
      p["iw1"], p["ib1"], p["iw2"], p["ib2"],
      p["tw1"], p["tb1"], p["tw2"], p["tb2"])

    # re/im are views of the concat slab (no duplicate kernel writeback);
    # unsqueeze(1) / x0copy are pure layout glue.
    re_s = concat_x[:, :Di]
    im_s = concat_x[:, Di:]
    return (
        concat_x,
        x1[:, None, :],
        x2[:, None, :],
        img[:, None, :],
        re_s[:, None, :],
        im_s[:, None, :],
    )


# --------------------------------------------------------------------------
# Synthetic parameters + references
# --------------------------------------------------------------------------
def init_params(key, img_dim, txt_dim):
    """Deterministic synthetic parameters matching the torch module's shapes."""
    ks = jax.random.split(key, 6)

    def linear(k, din, dout):
        bound = 1.0 / (din ** 0.5)
        kw, kb = jax.random.split(k)
        w = jax.random.uniform(kw, (din, dout), jnp.float32, -bound, bound)  # (in,out) = W.T
        b = jax.random.uniform(kb, (1, dout), jnp.float32, -bound, bound)
        return w, b

    def bn(k, d):
        k1, k2, k3, k4 = jax.random.split(k, 4)
        gamma = 1.0 + 0.1 * jax.random.normal(k1, (1, d), jnp.float32)
        beta = 0.1 * jax.random.normal(k2, (1, d), jnp.float32)
        mean = 0.1 * jax.random.normal(k3, (1, d), jnp.float32)
        var = 1.0 + 0.1 * jnp.abs(jax.random.normal(k4, (1, d), jnp.float32))
        return gamma, beta, mean, var

    ig, ib, imu, ivar = bn(ks[0], img_dim)
    iw1, ib1 = linear(ks[1], img_dim, img_dim)
    iw2, ib2 = linear(ks[2], img_dim, img_dim)
    tg, tb, tmu, tvar = bn(ks[3], txt_dim)
    tw1, tb1 = linear(ks[4], txt_dim, img_dim)
    tw2, tb2 = linear(ks[5], img_dim, img_dim)

    return dict(
        img_bn_gamma=ig, img_bn_beta=ib, img_bn_mean=imu, img_bn_var=ivar,
        img_w1=iw1, img_b1=ib1, img_w2=iw2, img_b2=ib2,
        txt_bn_gamma=tg, txt_bn_beta=tb, txt_bn_mean=tmu, txt_bn_var=tvar,
        txt_w1=tw1, txt_b1=tb1, txt_w2=tw2, txt_b2=tb2,
    )


def reference_eval(img, txt, conj, p):
    """Faithful eval-mode torch forward, f32 end-to-end."""
    conj = conj[: img.shape[0]]
    h = (img - p["img_bn_mean"]) / jnp.sqrt(p["img_bn_var"] + EPS)
    h = h * p["img_bn_gamma"] + p["img_bn_beta"]
    h = jnp.maximum(h @ p["img_w1"] + p["img_b1"], 0.0)
    x1 = h @ p["img_w2"] + p["img_b2"]
    g = (txt - p["txt_bn_mean"]) / jnp.sqrt(p["txt_bn_var"] + EPS)
    g = g * p["txt_bn_gamma"] + p["txt_bn_beta"]
    g = jnp.maximum(g @ p["txt_w1"] + p["txt_b1"], 0.0)
    x2 = g @ p["txt_w2"] + p["txt_b2"]
    re = x1 * jnp.cos(x2)
    im = x1 * (conj * jnp.sin(x2))
    return (
        jnp.concatenate([re, im], axis=1),
        x1[:, None, :], x2[:, None, :], img[:, None, :],
        re[:, None, :], im[:, None, :],
    )


def reference_kernel_path(img, txt, conj, params, mm_dtype):
    """Plain-JAX replica of the kernel's numeric path (BN folded, mm_dtype GEMMs)."""
    conj = conj[: img.shape[0]].astype(jnp.float32)
    p = fold_params(params, mm_dtype)
    h = jnp.dot(img.astype(mm_dtype), p["iw1"], preferred_element_type=jnp.float32) + p["ib1"]
    h = jnp.maximum(h, 0.0).astype(mm_dtype)
    x1 = jnp.dot(h, p["iw2"], preferred_element_type=jnp.float32) + p["ib2"]
    g = jnp.dot(txt.astype(mm_dtype), p["tw1"], preferred_element_type=jnp.float32) + p["tb1"]
    g = jnp.maximum(g, 0.0).astype(mm_dtype)
    x2 = jnp.dot(g, p["tw2"], preferred_element_type=jnp.float32) + p["tb2"]
    re = x1 * jnp.cos(x2)
    im = (x1 * conj) * jnp.sin(x2)
    return (
        jnp.concatenate([re, im], axis=1),
        x1[:, None, :], x2[:, None, :], img[:, None, :],
        re[:, None, :], im[:, None, :],
    )


# --------------------------------------------------------------------------
# Self-test
# --------------------------------------------------------------------------
if __name__ == "__main__":
    key = jax.random.PRNGKey(0)
    k_img, k_txt, k_par = jax.random.split(key, 3)

    N, DI, DT = 8, 128, 128   # small shapes; module default is 384/384
    img = jax.random.normal(k_img, (N, DI), jnp.float32)          # x[0]
    txt = jax.random.normal(k_txt, (N, DT), jnp.float32)          # x[1]
    conj = jnp.where(jnp.arange(N)[:, None] % 2 == 0, -1.0, 1.0)  # x[2]: (N,1) of +-1
    conj = conj.astype(jnp.float32)
    params = init_params(k_par, DI, DT)

    refs = reference_eval(img, txt, conj, params)

    # 1) f32-matmul path vs faithful eval-mode reference (tight tolerance).
    outs = jax.block_until_ready(
        complex_projection(img, txt, conj, params, use_bf16_matmul=False))
    for o, r in zip(outs, refs):
        assert o.shape == r.shape, (o.shape, r.shape)
        assert jnp.allclose(o, r, atol=2e-4, rtol=2e-4)

    # 2) bf16-matmul path (default; MXU): tight vs identical-numerics JAX
    #    replica, and loose vs the faithful f32 reference (checks the
    #    BN-fold + bf16 rounding interaction flagged in review).
    outs_bf = jax.block_until_ready(
        complex_projection(img, txt, conj, params, use_bf16_matmul=True))
    refs_bf = reference_kernel_path(img, txt, conj, params, jnp.bfloat16)
    for o, r in zip(outs_bf, refs_bf):
        assert o.shape == r.shape, (o.shape, r.shape)
        assert jnp.allclose(o, r, atol=2e-3, rtol=2e-3)
    for o, r in zip(outs_bf, refs):
        assert jnp.allclose(o, r, atol=6e-2, rtol=6e-2)

    # 3) Partial-tile path: N not a multiple of the tile and not a multiple
    #    of 8 (exercises the masked final block), f32 matmuls, tight tolerance.
    Np = 13
    img_p = jax.random.normal(jax.random.PRNGKey(1), (Np, DI), jnp.float32)
    txt_p = jax.random.normal(jax.random.PRNGKey(2), (Np, DT), jnp.float32)
    conj_p = jnp.where(jnp.arange(Np)[:, None] % 2 == 0, -1.0, 1.0).astype(jnp.float32)
    outs_p = jax.block_until_ready(
        complex_projection(img_p, txt_p, conj_p, params,
                           use_bf16_matmul=False, tile_n=8))
    refs_p = reference_eval(img_p, txt_p, conj_p, params)
    for o, r in zip(outs_p, refs_p):
        assert o.shape == r.shape, (o.shape, r.shape)
        assert jnp.allclose(o, r, atol=2e-4, rtol=2e-4)

    # 4) Reduced-HBM-byte output path (concat/x1/x2 in bf16) vs f32 reference.
    outs_b16 = jax.block_until_ready(
        complex_projection(img, txt, conj, params, use_bf16_matmul=True,
                           out_dtype=jnp.bfloat16))
    for o, r in zip(outs_b16, refs):
        assert o.shape == r.shape, (o.shape, r.shape)
        assert jnp.allclose(o.astype(jnp.float32), r, atol=8e-2, rtol=8e-2)

    print("KERNEL_OK")
</pallas_src>

<mosaic_0001>
module attributes {stable_mosaic.version = 11 : i64} {
  func.func @_complex_projection_kernel(%arg0: i32, %arg1: memref<8x128xf32, #tpu.memory_space<vmem>>, %arg2: memref<8x128xf32, #tpu.memory_space<vmem>>, %arg3: memref<8x1xf32, #tpu.memory_space<vmem>>, %arg4: memref<128x128xf32, #tpu.memory_space<vmem>>, %arg5: memref<1x128xf32, #tpu.memory_space<vmem>>, %arg6: memref<128x128xf32, #tpu.memory_space<vmem>>, %arg7: memref<1x128xf32, #tpu.memory_space<vmem>>, %arg8: memref<128x128xf32, #tpu.memory_space<vmem>>, %arg9: memref<1x128xf32, #tpu.memory_space<vmem>>, %arg10: memref<128x128xf32, #tpu.memory_space<vmem>>, %arg11: memref<1x128xf32, #tpu.memory_space<vmem>>, %arg12: memref<8x256xf32, #tpu.memory_space<vmem>>, %arg13: memref<8x128xf32, #tpu.memory_space<vmem>>, %arg14: memref<8x128xf32, #tpu.memory_space<vmem>>) attributes {dimension_semantics = [#tpu.dimension_semantics<parallel>], iteration_bounds = array<i64: 1>, scalar_prefetch = 0 : i64, scratch_operands = 0 : i64, tpu.core_type = #tpu.core_type<tc>, window_params = [{transform_indices = @transform_0, window_bounds = array<i64: 8, 128>}, {transform_indices = @transform_1, window_bounds = array<i64: 8, 128>}, {transform_indices = @transform_2, window_bounds = array<i64: 8, 1>}, {pipeline_mode = #tpu.pipeline_mode<synchronous>, transform_indices = @transform_3, window_bounds = array<i64: 128, 128>}, {pipeline_mode = #tpu.pipeline_mode<synchronous>, transform_indices = @transform_4, window_bounds = array<i64: 1, 128>}, {pipeline_mode = #tpu.pipeline_mode<synchronous>, transform_indices = @transform_5, window_bounds = array<i64: 128, 128>}, {pipeline_mode = #tpu.pipeline_mode<synchronous>, transform_indices = @transform_6, window_bounds = array<i64: 1, 128>}, {pipeline_mode = #tpu.pipeline_mode<synchronous>, transform_indices = @transform_7, window_bounds = array<i64: 128, 128>}, {pipeline_mode = #tpu.pipeline_mode<synchronous>, transform_indices = @transform_8, window_bounds = array<i64: 1, 128>}, {pipeline_mode = #tpu.pipeline_mode<synchronous>, transform_indices = @transform_9, window_bounds = array<i64: 128, 128>}, {pipeline_mode = #tpu.pipeline_mode<synchronous>, transform_indices = @transform_10, window_bounds = array<i64: 1, 128>}, {transform_indices = @transform_11, window_bounds = array<i64: 8, 256>}, {transform_indices = @transform_12, window_bounds = array<i64: 8, 128>}, {transform_indices = @transform_13, window_bounds = array<i64: 8, 128>}]} {
    %c0 = arith.constant 0 : index
    %c0_0 = arith.constant 0 : index
    %0 = vector.load %arg1[%c0, %c0_0] : memref<8x128xf32, #tpu.memory_space<vmem>>, vector<8x128xf32>
    %c0_1 = arith.constant 0 : index
    %c0_2 = arith.constant 0 : index
    %1 = vector.load %arg4[%c0_1, %c0_2] : memref<128x128xf32, #tpu.memory_space<vmem>>, vector<128x128xf32>
    %cst = arith.constant dense<0.000000e+00> : vector<8x128xf32>
    %2 = tpu.matmul %0, %1, %cst {dimension_numbers = #tpu.dot_dimension_numbers<[1], [0], [0], [1], [0, 0, 1, 1], [], []>} : vector<8x128xf32>, vector<128x128xf32>, vector<8x128xf32> -> vector<8x128xf32>
    %c0_3 = arith.constant 0 : index
    %c0_4 = arith.constant 0 : index
    %3 = vector.load %arg5[%c0_3, %c0_4] : memref<1x128xf32, #tpu.memory_space<vmem>>, vector<1x128xf32>
    %4 = vector.broadcast %3 : vector<1x128xf32> to vector<8x128xf32>
    %5 = arith.addf %2, %4 : vector<8x128xf32>
    %cst_5 = arith.constant 0.000000e+00 : f32
    %6 = vector.broadcast %cst_5 : f32 to vector<8x128xf32>
    %7 = arith.maximumf %5, %6 : vector<8x128xf32>
    %c0_6 = arith.constant 0 : index
    %c0_7 = arith.constant 0 : index
    %8 = vector.load %arg6[%c0_6, %c0_7] : memref<128x128xf32, #tpu.memory_space<vmem>>, vector<128x128xf32>
    %cst_8 = arith.constant dense<0.000000e+00> : vector<8x128xf32>
    %9 = tpu.matmul %7, %8, %cst_8 {dimension_numbers = #tpu.dot_dimension_numbers<[1], [0], [0], [1], [0, 0, 1, 1], [], []>} : vector<8x128xf32>, vector<128x128xf32>, vector<8x128xf32> -> vector<8x128xf32>
    %c0_9 = arith.constant 0 : index
    %c0_10 = arith.constant 0 : index
    %10 = vector.load %arg7[%c0_9, %c0_10] : memref<1x128xf32, #tpu.memory_space<vmem>>, vector<1x128xf32>
    %11 = vector.broadcast %10 : vector<1x128xf32> to vector<8x128xf32>
    %12 = arith.addf %9, %11 : vector<8x128xf32>
    %c0_11 = arith.constant 0 : index
    %c0_12 = arith.constant 0 : index
    %13 = vector.load %arg2[%c0_11, %c0_12] : memref<8x128xf32, #tpu.memory_space<vmem>>, vector<8x128xf32>
    %c0_13 = arith.constant 0 : index
    %c0_14 = arith.constant 0 : index
    %14 = vector.load %arg8[%c0_13, %c0_14] : memref<128x128xf32, #tpu.memory_space<vmem>>, vector<128x128xf32>
    %cst_15 = arith.constant dense<0.000000e+00> : vector<8x128xf32>
    %15 = tpu.matmul %13, %14, %cst_15 {dimension_numbers = #tpu.dot_dimension_numbers<[1], [0], [0], [1], [0, 0, 1, 1], [], []>} : vector<8x128xf32>, vector<128x128xf32>, vector<8x128xf32> -> vector<8x128xf32>
    %c0_16 = arith.constant 0 : index
    %c0_17 = arith.constant 0 : index
    %16 = vector.load %arg9[%c0_16, %c0_17] : memref<1x128xf32, #tpu.memory_space<vmem>>, vector<1x128xf32>
    %17 = vector.broadcast %16 : vector<1x128xf32> to vector<8x128xf32>
    %18 = arith.addf %15, %17 : vector<8x128xf32>
    %cst_18 = arith.constant 0.000000e+00 : f32
    %19 = vector.broadcast %cst_18 : f32 to vector<8x128xf32>
    %20 = arith.maximumf %18, %19 : vector<8x128xf32>
    %c0_19 = arith.constant 0 : index
    %c0_20 = arith.constant 0 : index
    %21 = vector.load %arg10[%c0_19, %c0_20] : memref<128x128xf32, #tpu.memory_space<vmem>>, vector<128x128xf32>
    %cst_21 = arith.constant dense<0.000000e+00> : vector<8x128xf32>
    %22 = tpu.matmul %20, %21, %cst_21 {dimension_numbers = #tpu.dot_dimension_numbers<[1], [0], [0], [1], [0, 0, 1, 1], [], []>} : vector<8x128xf32>, vector<128x128xf32>, vector<8x128xf32> -> vector<8x128xf32>
    %c0_22 = arith.constant 0 : index
    %c0_23 = arith.constant 0 : index
    %23 = vector.load %arg11[%c0_22, %c0_23] : memref<1x128xf32, #tpu.memory_space<vmem>>, vector<1x128xf32>
    %24 = vector.broadcast %23 : vector<1x128xf32> to vector<8x128xf32>
    %25 = arith.addf %22, %24 : vector<8x128xf32>
    %c0_24 = arith.constant 0 : index
    %c0_25 = arith.constant 0 : index
    %26 = vector.load %arg13[%c0_24, %c0_25] : memref<8x128xf32, #tpu.memory_space<vmem>>, vector<8x128xf32>
    tpu.vector_store %arg13[%c0_24, %c0_25], %12 {strides = array<i32>} : memref<8x128xf32, #tpu.memory_space<vmem>>, vector<8x128xf32>,
    %c0_26 = arith.constant 0 : index
    %c0_27 = arith.constant 0 : index
    %27 = vector.load %arg14[%c0_26, %c0_27] : memref<8x128xf32, #tpu.memory_space<vmem>>, vector<8x128xf32>
    tpu.vector_store %arg14[%c0_26, %c0_27], %25 {strides = array<i32>} : memref<8x128xf32, #tpu.memory_space<vmem>>, vector<8x128xf32>,
    %28 = math.cos %25 : vector<8x128xf32>
    %29 = arith.mulf %12, %28 : vector<8x128xf32>
    %c0_28 = arith.constant 0 : index
    %c0_29 = arith.constant 0 : index
    %30 = vector.load %arg12[%c0_28, %c0_29] : memref<8x256xf32, #tpu.memory_space<vmem>>, vector<8x128xf32>
    tpu.vector_store %arg12[%c0_28, %c0_29], %29 {strides = array<i32>} : memref<8x256xf32, #tpu.memory_space<vmem>>, vector<8x128xf32>,
    %c0_30 = arith.constant 0 : index
    %c0_31 = arith.constant 0 : index
    %31 = vector.load %arg3[%c0_30, %c0_31] : memref<8x1xf32, #tpu.memory_space<vmem>>, vector<8x1xf32>
    %32 = vector.broadcast %31 : vector<8x1xf32> to vector<8x128xf32>
    %33 = arith.mulf %12, %32 : vector<8x128xf32>
    %34 = math.sin %25 : vector<8x128xf32>
    %35 = arith.mulf %33, %34 : vector<8x128xf32>
    %c0_32 = arith.constant 0 : index
    %c128 = arith.constant 128 : index
    %36 = vector.load %arg12[%c0_32, %c128] : memref<8x256xf32, #tpu.memory_space<vmem>>, vector<8x128xf32>
    tpu.vector_store %arg12[%c0_32, %c128], %35 {strides = array<i32>} : memref<8x256xf32, #tpu.memory_space<vmem>>, vector<8x128xf32>,
    return
  }
  func.func @transform_0(%arg0: i32) -> (i32, i32) {
    %c0_i32 = arith.constant 0 : i32
    %c0_i32_0 = arith.constant 0 : i32
    return %arg0, %c0_i32 : i32, i32
  }
  func.func @transform_1(%arg0: i32) -> (i32, i32) {
    %c0_i32 = arith.constant 0 : i32
    %c0_i32_0 = arith.constant 0 : i32
    return %arg0, %c0_i32 : i32, i32
  }
  func.func @transform_2(%arg0: i32) -> (i32, i32) {
    %c0_i32 = arith.constant 0 : i32
    %c0_i32_0 = arith.constant 0 : i32
    return %arg0, %c0_i32 : i32, i32
  }
  func.func @transform_3(%arg0: i32) -> (i32, i32) {
    %c0_i32 = arith.constant 0 : i32
    %c0_i32_0 = arith.constant 0 : i32
    %c0_i32_1 = arith.constant 0 : i32
    return %c0_i32, %c0_i32_0 : i32, i32
  }
  func.func @transform_4(%arg0: i32) -> (i32, i32) {
    %c0_i32 = arith.constant 0 : i32
    %c0_i32_0 = arith.constant 0 : i32
    %c0_i32_1 = arith.constant 0 : i32
    return %c0_i32, %c0_i32_0 : i32, i32
  }
  func.func @transform_5(%arg0: i32) -> (i32, i32) {
    %c0_i32 = arith.constant 0 : i32
    %c0_i32_0 = arith.constant 0 : i32
    %c0_i32_1 = arith.constant 0 : i32
    return %c0_i32, %c0_i32_0 : i32, i32
  }
  func.func @transform_6(%arg0: i32) -> (i32, i32) {
    %c0_i32 = arith.constant 0 : i32
    %c0_i32_0 = arith.constant 0 : i32
    %c0_i32_1 = arith.constant 0 : i32
    return %c0_i32, %c0_i32_0 : i32, i32
  }
  func.func @transform_7(%arg0: i32) -> (i32, i32) {
    %c0_i32 = arith.constant 0 : i32
    %c0_i32_0 = arith.constant 0 : i32
    %c0_i32_1 = arith.constant 0 : i32
    return %c0_i32, %c0_i32_0 : i32, i32
  }
  func.func @transform_8(%arg0: i32) -> (i32, i32) {
    %c0_i32 = arith.constant 0 : i32
    %c0_i32_0 = arith.constant 0 : i32
    %c0_i32_1 = arith.constant 0 : i32
    return %c0_i32, %c0_i32_0 : i32, i32
  }
  func.func @transform_9(%arg0: i32) -> (i32, i32) {
    %c0_i32 = arith.constant 0 : i32
    %c0_i32_0 = arith.constant 0 : i32
    %c0_i32_1 = arith.constant 0 : i32
    return %c0_i32, %c0_i32_0 : i32, i32
  }
  func.func @transform_10(%arg0: i32) -> (i32, i32) {
    %c0_i32 = arith.constant 0 : i32
    %c0_i32_0 = arith.constant 0 : i32
    %c0_i32_1 = arith.constant 0 : i32
    return %c0_i32, %c0_i32_0 : i32, i32
  }
  func.func @transform_11(%arg0: i32) -> (i32, i32) {
    %c0_i32 = arith.constant 0 : i32
    %c0_i32_0 = arith.constant 0 : i32
    return %arg0, %c0_i32 : i32, i32
  }
  func.func @transform_12(%arg0: i32) -> (i32, i32) {
    %c0_i32 = arith.constant 0 : i32
    %c0_i32_0 = arith.constant 0 : i32
    return %arg0, %c0_i32 : i32, i32
  }
  func.func @transform_13(%arg0: i32) -> (i32, i32) {
    %c0_i32 = arith.constant 0 : i32
    %c0_i32_0 = arith.constant 0 : i32
    return %arg0, %c0_i32 : i32, i32
  }
}

</mosaic_0001>

<bundles_post_ra>
// kernel: tpu_custom_call.1
= control target key start
LH: loop header
LB: loop body
LE: loop exit
PB: predicated region body
PF: predicated region fallthrough
CT: control target
= control target key end

     0   :  { %19 = vsyncpa [#allocation3], 0  ;;  %s1081_s0 = inlined_call_operand.vmem [shape: f32[8,128], index: 0, kind: input, shape index: {}]   ;;  %s1082_s1 = inlined_call_operand.hbm [shape: f32[8,128], index: 1, kind: input, shape index: {}]   ;;  %s1083_s2 = inlined_call_operand.vmem [shape: f32[8,1], index: 2, kind: input, shape index: {}]   ;;  %s1084_s3 = inlined_call_operand.hbm [shape: f32[128,128], index: 3, kind: input, shape index: {}]   ;;  %s1085_s4 = inlined_call_operand.vmem [shape: f32[1,128], index: 4, kind: input, shape index: {}]   ;;  %s1086_s5 = inlined_call_operand.hbm [shape: f32[128,128], index: 5, kind: input, shape index: {}]   ;;  %s1087_s6 = inlined_call_operand.vmem [shape: f32[1,128], index: 6, kind: input, shape index: {}]   ;;  %s1088_s7 = inlined_call_operand.hbm [shape: f32[128,128], index: 7, kind: input, shape index: {}]   ;;  %s1089_s8 = inlined_call_operand.vmem [shape: f32[1,128], index: 8, kind: input, shape index: {}]   ;;  %s1090_s9 = inlined_call_operand.hbm [shape: f32[128,128], index: 9, kind: input, shape index: {}]   ;;  %s1091_s10 = inlined_call_operand.vmem [shape: f32[1,128], index: 10, kind: input, shape index: {}]   ;;  %s1092_s11 = inlined_call_operand.hbm [shape: f32[8,256], index: 11, kind: output, shape index: {0}]   ;;  %s1093_s12 = inlined_call_operand.hbm [shape: f32[8,128], index: 12, kind: output, shape index: {1}]   ;;  %s1094_s13 = inlined_call_operand.hbm [shape: f32[8,128], index: 13, kind: output, shape index: {2}]  }
   0x1   :  { %20 = vsyncpa [#allocation6], 0 }
   0x2   :  { %21 = vsyncpa [#allocation9], 0 }
   0x3   :  { %22 = vsyncpa [#allocation4], 0  ;;  %s43_s27 = sshll.u32 %s1084_s3, 4  ;;  %s44_s27 = int_to_ptr.hbm [resolvable:$true] %s43_s27 }
   0x4   :  { %23 = vsyncpa [#allocation13], 0  ;;  %s885_s28 = smov [#allocation5]   ;;  %s73_s15 = sshll.u32 %s1088_s7, 4  ;;  %s74_s15 = int_to_ptr.hbm [resolvable:$true] %s73_s15 }
   0x5   :  { %s45_s29 = sshll.u32 %s885_s28, 4  ;;  %s886_s16 = smov 128   ;;  %s46_s29 = int_to_ptr.vmem [resolvable:$true] %s45_s29 }
   0x6   :  { %s887_s17 = smov 8   ;;  %s888_s18 = smov [#allocation8]  }
   0x7   :  { %51 = dma.hbm_to_vmem [thread:$0]  %s44_s27, 2048, %s46_s29, [#allocation6], %s886_s16, %s886_s16, %s887_s17  }
   0x8   :  { %s75_s19 = sshll.u32 %s888_s18, 4  ;;  %s31_s22 = sshll.u32 %s1082_s1, 4  ;;  %s76_s19 = int_to_ptr.vmem [resolvable:$true] %s75_s19  ;;  %s32_s22 = int_to_ptr.hbm [resolvable:$true] %s31_s22 }
   0x9   :  { %81 = dma.hbm_to_vmem [thread:$0]  %s74_s15, 2048, %s76_s19, [#allocation9], %s886_s16, %s886_s16, %s887_s17  }
   0xa   :  { %s58_s24 = sshll.u32 %s1086_s5, 4  ;;  %s889_s25 = smov [#allocation2]   ;;  %s59_s24 = int_to_ptr.hbm [resolvable:$true] %s58_s24 }
   0xb   :  { %s33_s26 = sshll.u32 %s889_s25, 4  ;;  %s890_s7 = smov [#allocation7]   ;;  %s34_s26 = int_to_ptr.vmem [resolvable:$true] %s33_s26 }
   0xc   :  { %36 = dma.hbm_to_vmem [thread:$0]  %s32_s22, 128, %s34_s26, [#allocation3]  }
   0xd   :  { %s60_s27 = sshll.u32 %s890_s7, 4  ;;  %s88_s30 = sshll.u32 %s1090_s9, 4  ;;  %s61_s27 = int_to_ptr.vmem [resolvable:$true] %s60_s27  ;;  %s89_s30 = int_to_ptr.hbm [resolvable:$true] %s88_s30 }
   0xe   :  { %66 = dma.hbm_to_vmem [thread:$0]  %s59_s24, 2048, %s61_s27, [#allocation6], %s886_s16, %s886_s16, %s887_s17  }
   0xf   :  { %s891_s1 = smov [#allocation10]  }
  0x10   :  { %s90_s14 = sshll.u32 %s891_s1, 4  ;;  %s91_s14 = int_to_ptr.vmem [resolvable:$true] %s90_s14 }
  0x11   :  { %96 = dma.hbm_to_vmem [thread:$0]  %s89_s30, 2048, %s91_s14, [#allocation9], %s886_s16, %s886_s16, %s887_s17  }
  0x12   :  { %875 = dma.done.wait [#allocation3], 128  }
  0x13   :  { %876 = vsyncadd [#allocation3], 4294967168 }
  0x14   :  { %877 = dma.done.wait [#allocation6], 4096  }
  0x15   :  { %878 = vsyncadd [#allocation6], 4294963200 }
  0x16   :  { %879 = dma.done.wait [#allocation9], 4096  }
  0x17   :  { %880 = vsyncadd [#allocation9], 4294963200  ;;  %v217_v0 = vld [vmem:[#allocation8 + $0x78] sm:$0xff]  ;;  %v216_v1 = vld [vmem:[#allocation8 + $0x70] sm:$0xff]  ;;  %v892_v52 = vmov 0   ;;  %s623_s3 = sshll.u32 %s1093_s12, 4  ;;  %s624_s3 = int_to_ptr.hbm [resolvable:$true] %s623_s3 }
  0x18   :  { %222 = vmatpush.msra.mxu2 %v217_v0  ;;  %v215_v2 = vld [vmem:[#allocation8 + $0x68] sm:$0xff]  ;;  %v214_v3 = vld [vmem:[#allocation8 + $0x60] sm:$0xff]  ;;  %v135_v4 = vld [vmem:[#allocation5 + $0x78] sm:$0xff]  ;;  %678 = vset.pattern.permute.xlu0 %v892_v52  ;;  %s894_s25 = smov [#allocation14]   ;;  %s634_s27 = sshll.u32 %s1094_s13, 4  ;;  %s635_s27 = int_to_ptr.hbm [resolvable:$true] %s634_s27 }
  0x19   :  { %v213_v5 = vld [vmem:[#allocation8 + $0x58] sm:$0xff]  ;;  %140 = vmatpush.msra.mxu0 %v135_v4  ;;  %v134_v6 = vld [vmem:[#allocation5 + $0x70] sm:$0xff]  ;;  %v133_v7 = vld [vmem:[#allocation5 + $0x68] sm:$0xff]  ;;  %s632_s26 = sshll.u32 %s894_s25, 4  ;;  %s612_s29 = sshll.u32 %s1092_s11, 4  ;;  %s633_s26 = int_to_ptr.vmem [resolvable:$true] %s632_s26  ;;  %s613_s29 = int_to_ptr.hbm [resolvable:$true] %s612_s29 }
  0x1a   :  { %223 = vmatpush.msra.mxu2 %v216_v1  ;;  %v212_v8 = vld [vmem:[#allocation8 + $0x50] sm:$0xff]  ;;  %v132_v9 = vld [vmem:[#allocation5 + $0x60] sm:$0xff]  ;;  %v211_v10 = vld [vmem:[#allocation8 + $0x48] sm:$0xff] }
  0x1b   :  { %141 = vmatpush.msra.mxu0 %v134_v6  ;;  %v131_v11 = vld [vmem:[#allocation5 + $0x58] sm:$0xff]  ;;  %v257_v13 = vld [vmem:[#allocation10 + $0x70] sm:$0xff]  ;;  %v210_v14 = vld [vmem:[#allocation8 + $0x40] sm:$0xff] }
  0x1c   :  { %224 = vmatpush.msra.mxu2 %v215_v2  ;;  %v258_v12 = vld [vmem:[#allocation10 + $0x78] sm:$0xff]  ;;  %v130_v15 = vld [vmem:[#allocation5 + $0x50] sm:$0xff]  ;;  %v256_v16 = vld [vmem:[#allocation10 + $0x68] sm:$0xff] }
  0x1d   :  { %142 = vmatpush.msra.mxu0 %v133_v7  ;;  %263 = vmatpush.msra.mxu3 %v258_v12  ;;  %v209_v17 = vld [vmem:[#allocation8 + $0x38] sm:$0xff]  ;;  %v129_v18 = vld [vmem:[#allocation5 + $0x48] sm:$0xff]  ;;  %v255_v19 = vld [vmem:[#allocation10 + $0x60] sm:$0xff] }
  0x1e   :  { %225 = vmatpush.msra.mxu2 %v214_v3  ;;  %v208_v20 = vld [vmem:[#allocation8 + $0x30] sm:$0xff]  ;;  %v128_v21 = vld [vmem:[#allocation5 + $0x40] sm:$0xff]  ;;  %v254_v22 = vld [vmem:[#allocation10 + $0x58] sm:$0xff] }
  0x1f   :  { %143 = vmatpush.msra.mxu0 %v132_v9  ;;  %264 = vmatpush.msra.mxu3 %v257_v13  ;;  %v207_v23 = vld [vmem:[#allocation8 + $0x28] sm:$0xff]  ;;  %v127_v24 = vld [vmem:[#allocation5 + $0x38] sm:$0xff]  ;;  %v253_v25 = vld [vmem:[#allocation10 + $0x50] sm:$0xff] }
  0x20   :  { %226 = vmatpush.msra.mxu2 %v213_v5  ;;  %v206_v26 = vld [vmem:[#allocation8 + $0x20] sm:$0xff]  ;;  %v126_v27 = vld [vmem:[#allocation5 + $0x30] sm:$0xff]  ;;  %v252_v28 = vld [vmem:[#allocation10 + $0x48] sm:$0xff] }
  0x21   :  { %144 = vmatpush.msra.mxu0 %v131_v11  ;;  %265 = vmatpush.msra.mxu3 %v256_v16  ;;  %v205_v29 = vld [vmem:[#allocation8 + $0x18] sm:$0xff]  ;;  %v125_v30 = vld [vmem:[#allocation5 + $0x28] sm:$0xff]  ;;  %v251_v31 = vld [vmem:[#allocation10 + $0x40] sm:$0xff] }
  0x22   :  { %227 = vmatpush.msra.mxu2 %v212_v8  ;;  %v204_v32 = vld [vmem:[#allocation8 + $0x10] sm:$0xff]  ;;  %v124_v33 = vld [vmem:[#allocation5 + $0x20] sm:$0xff]  ;;  %v250_v34 = vld [vmem:[#allocation10 + $0x38] sm:$0xff] }
  0x23   :  { %145 = vmatpush.msra.mxu0 %v130_v15  ;;  %266 = vmatpush.msra.mxu3 %v255_v19  ;;  %v203_v35 = vld [vmem:[#allocation8 + $0x8] sm:$0xff]  ;;  %v123_v36 = vld [vmem:[#allocation5 + $0x18] sm:$0xff]  ;;  %v249_v37 = vld [vmem:[#allocation10 + $0x30] sm:$0xff] }
  0x24   :  { %228 = vmatpush.msra.mxu2 %v211_v10  ;;  %v202_v38 = vld [vmem:[#allocation8] sm:$0xff]  ;;  %v201_v39 = vld [vmem:[#allocation2] sm:$0xff]  ;;  %v122_v40 = vld [vmem:[#allocation5 + $0x10] sm:$0xff] }
  0x25   :  { %146 = vmatpush.msra.mxu0 %v129_v18  ;;  %267 = vmatpush.msra.mxu3 %v254_v22  ;;  %v248_v41 = vld [vmem:[#allocation10 + $0x28] sm:$0xff]  ;;  %v247_v43 = vld [vmem:[#allocation10 + $0x20] sm:$0xff]  ;;  %v119_v45 = vld [vmem:[%s1081_s0] sm:$0xff] }
  0x26   :  { %229 = vmatpush.msra.mxu2 %v210_v14  ;;  %v121_v42 = vld [vmem:[#allocation5 + $0x8] sm:$0xff]  ;;  %v120_v44 = vld [vmem:[#allocation5] sm:$0xff]  ;;  %v246_v46 = vld [vmem:[#allocation10 + $0x18] sm:$0xff] }
  0x27   :  { %147 = vmatpush.msra.mxu0 %v128_v21  ;;  %268 = vmatpush.msra.mxu3 %v253_v25  ;;  %v245_v47 = vld [vmem:[#allocation10 + $0x10] sm:$0xff]  ;;  %v244_v48 = vld [vmem:[#allocation10 + $0x8] sm:$0xff]  ;;  %v243_v49 = vld [vmem:[#allocation10] sm:$0xff] }
  0x28   :  { %230 = vmatpush.msra.mxu2 %v209_v17  ;;  %v176_v50 = vld [vmem:[#allocation7 + $0x78] sm:$0xff]  ;;  %v175_v51 = vld [vmem:[#allocation7 + $0x70] sm:$0xff]  ;;  %v174_v53 = vld [vmem:[#allocation7 + $0x68] sm:$0xff] }
  0x29   :  { %148 = vmatpush.msra.mxu0 %v127_v24  ;;  %269 = vmatpush.msra.mxu3 %v252_v28  ;;  %v173_v54 = vld [vmem:[#allocation7 + $0x60] sm:$0xff]  ;;  %v441_v55 = vld [vmem:[%s1083_s2] sm:$0xff]  ;;  %v171_v57 = vld [vmem:[#allocation7 + $0x50] sm:$0xff] }
  0x2a   :  { %231 = vmatpush.msra.mxu2 %v208_v20  ;;  %181 = vmatpush.msra.mxu1 %v176_v50  ;;  %v172_v56 = vld [vmem:[#allocation7 + $0x58] sm:$0xff]  ;;  %v170_v58 = vld [vmem:[#allocation7 + $0x48] sm:$0xff]  ;;  %v169_v59 = vld [vmem:[#allocation7 + $0x40] sm:$0xff] }
  0x2b   :  { %149 = vmatpush.msra.mxu0 %v126_v27  ;;  %270 = vmatpush.msra.mxu3 %v251_v31  ;;  %v168_v60 = vld [vmem:[#allocation7 + $0x38] sm:$0xff]  ;;  %v167_v61 = vld [vmem:[#allocation7 + $0x30] sm:$0xff]  ;;  %v166_v62 = vld [vmem:[#allocation7 + $0x28] sm:$0xff]  ;;  %v896_v31 = vmov 2475754826  }
  0x2c   :  { %232 = vmatpush.msra.mxu2 %v207_v23  ;;  %182 = vmatpush.msra.mxu1 %v175_v51  ;;  %v165_v63 = vld [vmem:[#allocation7 + $0x20] sm:$0xff]  ;;  %v164_v0 = vld [vmem:[#allocation7 + $0x18] sm:$0xff]  ;;  %v163_v3 = vld [vmem:[#allocation7 + $0x10] sm:$0xff] }
  0x2d   :  { %150 = vmatpush.msra.mxu0 %v125_v30  ;;  %271 = vmatpush.msra.mxu3 %v250_v34  ;;  %v680_v1 = vld [vmem:[%s1085_s4] ss:$0 sm:$0xff]  ;;  %v162_v5 = vld [vmem:[#allocation7 + $0x8] sm:$0xff]  ;;  %v161_v9 = vld [vmem:[#allocation7] sm:$0xff]  ;;  %v897_v34 = vmov 2131351028  }
  0x2e   :  { %233 = vmatpush.msra.mxu2 %v206_v26  ;;  %183 = vmatpush.msra.mxu1 %v174_v53  ;;  %v679_v2 = vld [vmem:[%s1089_s8] ss:$0 sm:$0xff]  ;;  %s893_s8 = smov [#allocation12]  }
  0x2f   :  { %151 = vmatpush.msra.mxu0 %v124_v33  ;;  %272 = vmatpush.msra.mxu3 %v249_v37  ;;  %v682_v12 = vld [vmem:[%s1087_s6] ss:$0 sm:$0xff]  ;;  %s621_s20 = sshll.u32 %s893_s8, 4  ;;  %v898_v37 = vmov 2102212464   ;;  %s622_s20 = int_to_ptr.vmem [resolvable:$true] %s621_s20 }
  0x30   :  { %234 = vmatpush.msra.mxu2 %v205_v29  ;;  %444 = vperm.xlu0 %678, %v441_v55   ;;  %v681_v15 = vld [vmem:[%s1091_s10] ss:$0 sm:$0xff]  ;;  %v895_v29 = vmov 683565275   ;;  %s901_s10 = smov [#allocation11]  }
  0x31   :  { %152 = vmatpush.msra.mxu0 %v123_v36  ;;  %273 = vmatpush.msra.mxu3 %v248_v41  ;;  %s610_s12 = sshll.u32 %s901_s10, 4  ;;  %s611_s12 = int_to_ptr.vmem [resolvable:$true] %s610_s12 }
  0x32   :  { %235 = vmatpush.msra.mxu2 %v204_v32  ;;  %184 = vmatpush.msra.mxu1 %v173_v54 }
  0x33   :  { %153 = vmatpush.msra.mxu0 %v122_v40  ;;  %274 = vmatpush.msra.mxu3 %v247_v43  ;;  %v899_v40 = vmov 920167782   ;;  %v900_v43 = vmov 1326507024  }
  0x34   :  { %236 = vmatpush.msra.mxu2 %v203_v35  ;;  %185 = vmatpush.msra.mxu1 %v172_v56 }
  0x35   :  { %154 = vmatpush.msra.mxu0 %v121_v42  ;;  %275 = vmatpush.msra.mxu3 %v246_v46 }
  0x36   :  { %237 = vmatpush.msra.mxu2 %v202_v38  ;;  %186 = vmatpush.msra.mxu1 %v171_v57 }
  0x37   :  { %238 = vmatmul.f32.vlgmr.msra.gmra.mxu2 %v201_v39  ;;  %155 = vmatpush.msra.mxu0 %v120_v44 }
  0x38   :  { %156 = vmatmul.f32.vlgmr.msra.gmra.mxu0 %v119_v45  ;;  %276 = vmatpush.msra.mxu3 %v245_v47 }
  0x39   :  { %187 = vmatpush.msra.mxu1 %v170_v58 }
  0x3a   :  { %277 = vmatpush.msra.mxu3 %v244_v48 }
  0x3b   :  { %188 = vmatpush.msra.mxu1 %v169_v59 }
  0x3c   :  { %278 = vmatpush.msra.mxu3 %v243_v49 }
  0x3d   :  { %189 = vmatpush.msra.mxu1 %v168_v60 }
  0x3f   :  { %190 = vmatpush.msra.mxu1 %v167_v61 }
  0x41   :  { %191 = vmatpush.msra.mxu1 %v166_v62 }
  0x43   :  { %192 = vmatpush.msra.mxu1 %v165_v63 }
  0x45   :  { %193 = vmatpush.msra.mxu1 %v164_v0 }
  0x47   :  { %194 = vmatpush.msra.mxu1 %v163_v3 }
  0x49   :  { %195 = vmatpush.msra.mxu1 %v162_v5 }
  0x4b   :  { %196 = vmatpush.msra.mxu1 %v161_v9 }
  0xb5   :  { %v157_v4 = vpop.f32.mrf.mxu0 }
  0xb6   :  { %v158_v7 = vadd.f32 %v680_v1, %v157_v4 }
  0xb8   :  { %v160_v10 = vmax.f32 %v158_v7, 0.0 }
  0xba   :  { %v239_v6 = vpop.f32.mrf.mxu2  ;;  %197 = vmatmul.f32.vlgmr.msra.gmra.mxu1 %v160_v10 }
  0xbb   :  { %v240_v8 = vadd.f32 %v679_v2, %v239_v6 }
  0xbd   :  { %v242_v11 = vmax.f32 %v240_v8, 0.0 }
  0xbf   :  { %279 = vmatmul.f32.vlgmr.msra.gmra.mxu3 %v242_v11 }
 0x137   :  { %v198_v13 = vpop.f32.mrf.mxu1 }
 0x138   :  { %v1006_v14 = vadd.f32 %v682_v12, %v198_v13 }
 0x13a   :  { %283 = vst [vmem:[#allocation12] sm:$0xff] %v1006_v14 }
 0x13b   :  { %626 = dma.vmem_to_hbm [thread:$0]  %s622_s20, 128, %s624_s3, [#allocation13]  }
 0x142   :  { %v280_v16 = vpop.f32.mrf.mxu3 }
 0x143   :  { %v1015_v17 = vadd.f32 %v681_v15, %v280_v16 }
 0x145   :  { %v288_v18 = vand.u32 2139095040, %v1015_v17  ;;  %284 = vst [vmem:[#allocation14] sm:$0xff] %v1015_v17  ;;  %v285_v21 = vand.u32 2147483647, %v1015_v17  ;;  %vm287_vm12 = vcmp.lt.s32.totalorder %v1015_v17, 0 }
 0x146   :  { %637 = dma.vmem_to_hbm [thread:$0]  %s633_s26, 128, %s635_s27, [#allocation13]  }
 0x147   :  { %v289_v19 = vshrl.u32 %v288_v18, 23  ;;  %v292_v24 = vand.u32 8388607, %v285_v21  ;;  %vm286_vm13 = vcmp.le.f32.partialorder %v285_v21, 0.7853982 }
 0x149   :  { %v655_v20 = vadd.s32 4294967169, %v289_v19  ;;  %v293_v28 = vor.u32 8388608, %v292_v24 }
 0x14b   :  { %v295_v22 = vadd.s32 1, %v655_v20  ;;  %v1033_v50 = vshll.u32 %v293_v28, 8 }
 0x14d   :  { %vm296_vm0 = vcmp.gt.s32.totalorder %v295_v22, 0  ;;  %v334_v60 = vand.u32 65535, %v1033_v50  ;;  %v335_v61 = vshrl.u32 %v1033_v50, 16 }
 0x14e   :  { %v297_v23 = vsel %vm296_vm0, %v295_v22, 0 }
 0x14f   :  { %v299_v25 = vand.u32 31, %v297_v23  ;;  %v1024_v27 = vshrl.u32 %v297_v23, 5 }
 0x151   :  { %v1022_v26 = vsub.s32 32, %v299_v25  ;;  %v302_v30 = vshll.u32 %v895_v29, %v299_v25  ;;  %v305_v32 = vshll.u32 %v896_v31, %v299_v25  ;;  %v308_v36 = vshll.u32 %v897_v34, %v299_v25 }
 0x152   :  { %v311_v39 = vshll.u32 %v898_v37, %v299_v25  ;;  %v314_v42 = vshll.u32 %v899_v40, %v299_v25  ;;  %vm317_vm1 = vcmp.lt.s32.totalorder %v1024_v27, 1  ;;  %vm320_vm2 = vcmp.lt.s32.totalorder %v1024_v27, 4 }
 0x153   :  { %v303_v33 = vshrl.u32 %v896_v31, %v1022_v26  ;;  %v306_v35 = vshrl.u32 %v897_v34, %v1022_v26  ;;  %v309_v38 = vshrl.u32 %v898_v37, %v1022_v26  ;;  %v312_v41 = vshrl.u32 %v899_v40, %v1022_v26 }
 0x154   :  { %v315_v44 = vshrl.u32 %v900_v43, %v1022_v26  ;;  %vm319_vm3 = vcmp.lt.s32.totalorder %v1024_v27, 3  ;;  %vm318_vm4 = vcmp.lt.s32.totalorder %v1024_v27, 2  ;;  %v301_v25 = vshrl.u32 %v895_v29, %v1022_v26 }
 0x155   :  { %v304_v45 = vor.u32 %v303_v33, %v302_v30  ;;  %v307_v46 = vor.u32 %v306_v35, %v305_v32  ;;  %v310_v47 = vor.u32 %v309_v38, %v308_v36  ;;  %v313_v48 = vor.u32 %v312_v41, %v311_v39 }
 0x156   :  { %v316_v49 = vor.u32 %v315_v44, %v314_v42 }
 0x157   :  { %v325_v51 = vsel %vm317_vm1, %v304_v45, %v307_v46  ;;  %v329_v53 = vsel %vm317_vm1, %v307_v46, %v310_v47  ;;  %v326_v54 = vsel %vm320_vm2, %v313_v48, 920167782  ;;  %v322_v22 = vsel %vm320_vm2, %v310_v47, 2102212464 }
 0x158   :  { %v330_v55 = vsel %vm320_vm2, %v316_v49, 1326507024  ;;  %v327_v56 = vsel %vm319_vm3, %v310_v47, %v326_v54  ;;  %v321_v34 = vsel %vm317_vm1, %v301_v25, %v304_v45  ;;  %v323_v35 = vsel %vm319_vm3, %v307_v46, %v322_v22 }
 0x159   :  { %v331_v57 = vsel %vm319_vm3, %v313_v48, %v330_v55  ;;  %v328_v58 = vsel %vm318_vm4, %v325_v51, %v327_v56  ;;  %v324_v26 = vsel %vm318_vm4, %v321_v34, %v323_v35 }
 0x15a   :  { %v332_v59 = vsel %vm318_vm4, %v329_v53, %v331_v57  ;;  %v358_v0 = vand.u32 65535, %v328_v58  ;;  %v359_v1 = vshrl.u32 %v328_v58, 16  ;;  %v378_v42 = vmul.u32 %v1033_v50, %v324_v26 }
 0x15b   :  { %v336_v62 = vand.u32 65535, %v332_v59  ;;  %v337_v63 = vshrl.u32 %v332_v59, 16  ;;  %vm428_vm4 = vweird.f32 %v1015_v17 }
 0x15c   :  { %v361_v4 = vmul.u32 %v359_v1, %v334_v60  ;;  %v362_v5 = vmul.u32 %v358_v0, %v335_v61  ;;  %v360_v9 = vmul.u32 %v358_v0, %v334_v60  ;;  %v363_v13 = vmul.u32 %v359_v1, %v335_v61 }
 0x15d   :  { %v339_v2 = vmul.u32 %v337_v63, %v334_v60  ;;  %v340_v3 = vmul.u32 %v336_v62, %v335_v61  ;;  %v338_v6 = vmul.u32 %v336_v62, %v334_v60  ;;  %v341_v8 = vmul.u32 %v337_v63, %v335_v61 }
 0x15e   :  { %v364_v10 = vshll.u32 %v361_v4, 16  ;;  %v366_v16 = vshll.u32 %v362_v5, 16  ;;  %v365_v32 = vshrl.u32 %v361_v4, 16  ;;  %v367_v38 = vshrl.u32 %v362_v5, 16 }
 0x15f   :  { %v342_v7 = vshll.u32 %v339_v2, 16  ;;  %v344_v11 = vshll.u32 %v340_v3, 16  ;;  %v343_v28 = vshrl.u32 %v339_v2, 16  ;;  %v345_v36 = vshrl.u32 %v340_v3, 16 }
 0x160   :  { %vm368_vm6 = vc.u32 %v360_v9, %v364_v10  ;;  %v370_v18 = vadd.s32 %v364_v10, %v360_v9 }
 0x161   :  { %vm346_vm5 = vc.u32 %v338_v6, %v342_v7  ;;  %v348_v12 = vadd.s32 %v342_v7, %v338_v6  ;;  %v369_v20 = vsel %vm368_vm6, 1, %v892_v52 }
 0x162   :  { %v347_v15 = vsel %vm346_vm5, 1, %v892_v52  ;;  %v371_v24 = vadd.s32 %v369_v20, %v363_v13  ;;  %vm372_vm8 = vc.u32 %v370_v18, %v366_v16  ;;  %v374_v41 = vadd.s32 %v370_v18, %v366_v16 }
 0x163   :  { %v349_v19 = vadd.s32 %v347_v15, %v341_v8  ;;  %vm350_vm7 = vc.u32 %v348_v12, %v344_v11  ;;  %v373_v31 = vsel %vm372_vm8, 1, %v892_v52 }
 0x164   :  { %v351_v23 = vsel %vm350_vm7, 1, %v892_v52  ;;  %v375_v33 = vadd.s32 %v373_v31, %v371_v24 }
 0x165   :  { %v353_v30 = vadd.s32 %v351_v23, %v349_v19 }
 0x166   :  { %v376_v39 = vadd.s32 %v375_v33, %v365_v32 }
 0x167   :  { %v354_v37 = vadd.s32 %v353_v30, %v343_v28  ;;  %v445_v28 = vpop.permute.xlu0 %444 }
 0x168   :  { %v377_v29 = vadd.s32 %v376_v39, %v367_v38  ;;  %v447_v33 = vmul.f32 %v445_v28, %v1006_v14 }
 0x169   :  { %v355_v40 = vadd.s32 %v354_v37, %v345_v36 }
 0x16a   :  { %v381_v52 = vadd.s32 1, %v377_v29 }
 0x16b   :  { %vm380_vm9 = vc.u32 %v355_v40, %v374_v41  ;;  %v379_v27 = vadd.s32 %v374_v41, %v355_v40 }
 0x16c   :  { %v382_v43 = vsel %vm380_vm9, %v381_v52, %v377_v29 }
 0x16d   :  { %v383_v44 = vadd.s32 %v382_v43, %v378_v42 }
 0x16f   :  { %v384_v45 = vadd.s32 536870912, %v383_v44 }
 0x171   :  { %v385_v47 = vshrl.u32 %v384_v45, 30 }
 0x173   :  { %v386_v48 = vshll.u32 %v385_v47, 30  ;;  %v409_v4 = vsub.s32 4, %v385_v47 }
 0x175   :  { %v387_v46 = vsub.s32 %v383_v44, %v386_v48  ;;  %v410_v9 = vsel %vm287_vm12, %v409_v4, %v385_v47 }
 0x176   :  { %v412_v12 = vsel %vm286_vm13, 0, %v410_v9 }
 0x177   :  { %vm388_vm10 = vcmp.lt.s32.totalorder %v387_v46, 0  ;;  %v389_v49 = vsub.s32 0, %v387_v46  ;;  %v592_v19 = vadd.s32 3, %v412_v12  ;;  %v429_v24 = vand.u32 3, %v412_v12 }
 0x179   :  { %v390_v51 = vsel %vm388_vm10, %v389_v49, %v387_v46  ;;  %v593_v25 = vand.u32 3, %v592_v19  ;;  %vm430_vm14 = vcmp.lt.s32.totalorder %v429_v24, 2  ;;  %vm431_vm15 = vcmp.eq.s32.totalorder %v429_v24, 0 }
 0x17a   :  { %v391_v53 = vclz %v390_v51  ;;  %vm434_vm0 = vcmp.eq.s32.totalorder %v429_v24, 2 }
 0x17b   :  { %vm594_vm1 = vcmp.lt.s32.totalorder %v593_v25, 2  ;;  %vm595_vm2 = vcmp.eq.s32.totalorder %v593_v25, 0  ;;  %vm598_vm3 = vcmp.eq.s32.totalorder %v593_v25, 2 }
 0x17c   :  { %v656_v54 = vadd.s32 4294967294, %v391_v53 }
 0x17e   :  { %vm657_vm11 = vcmp.lt.s32.totalorder %v656_v54, 0 }
 0x17f   :  { %v394_v55 = vsel %vm657_vm11, 0, %v656_v54 }
 0x180   :  { %v395_v56 = vsub.s32 32, %v394_v55  ;;  %v399_v57 = vsub.s32 4294967266, %v394_v55  ;;  %v396_v58 = vshll.u32 %v387_v46, %v394_v55 }
 0x182   :  { %v397_v59 = vshrl.u32 %v379_v27, %v395_v56  ;;  %v400_v60 = vadd.s32 127, %v399_v57 }
 0x184   :  { %v398_v50 = vor.u32 %v397_v59, %v396_v58  ;;  %v401_v61 = vshll.u32 %v400_v60, 23 }
 0x186   :  { %v402_v62 = vor.u32 4788187, %v401_v61  ;;  %v405_v0 = vcvt.s32.f32 %v398_v50 }
 0x188   :  { %v403_v63 = vand.u32 2147483647, %v402_v62 }
 0x18a   :  { %v406_v1 = vmul.f32 %v405_v0, %v403_v63 }
 0x18c   :  { %v407_v2 = vxor.u32 2147483648, %v406_v1 }
 0x18e   :  { %v408_v3 = vsel %vm287_vm12, %v407_v2, %v406_v1 }
 0x18f   :  { %v411_v5 = vsel %vm286_vm13, %v1015_v17, %v408_v3 }
 0x190   :  { %v413_v6 = vmul.f32 %v411_v5, %v411_v5 }
 0x192   :  { %v414_v7 = vmul.f32 -0.001358992, %v413_v6  ;;  %v421_v8 = vmul.f32 -0.00019511016, %v413_v6 }
 0x194   :  { %v415_v10 = vadd.f32 0.041655596, %v414_v7  ;;  %v422_v11 = vadd.f32 0.008332121, %v421_v8 }
 0x196   :  { %v416_v13 = vmul.f32 %v415_v10, %v413_v6  ;;  %v423_v15 = vmul.f32 %v422_v11, %v413_v6 }
 0x198   :  { %v417_v16 = vadd.f32 -0.4999988, %v416_v13  ;;  %v424_v18 = vadd.f32 -0.16666654, %v423_v15 }
 0x19a   :  { %v418_v20 = vmul.f32 %v417_v16, %v413_v6  ;;  %v425_v22 = vmul.f32 %v424_v18, %v413_v6 }
 0x19c   :  { %v419_v23 = vadd.f32 1.0, %v418_v20  ;;  %v426_v21 = vadd.f32 1.0, %v425_v22 }
 0x19e   :  { %v427_v30 = vmul.f32 %v426_v21, %v411_v5  ;;  %v435_v31 = vxor.u32 2147483648, %v419_v23 }
 0x1a0   :  { %v432_v32 = vxor.u32 2147483648, %v427_v30  ;;  %v436_v35 = vsel %vm434_vm0, %v435_v31, %v427_v30  ;;  %v600_v37 = vsel %vm598_vm3, %v435_v31, %v427_v30 }
 0x1a2   :  { %v433_v34 = vsel %vm431_vm15, %v419_v23, %v432_v32  ;;  %v597_v36 = vsel %vm595_vm2, %v419_v23, %v432_v32 }
 0x1a3   :  { %v437_v38 = vsel %vm430_vm14, %v433_v34, %v436_v35  ;;  %v601_v39 = vsel %vm594_vm1, %v597_v36, %v600_v37 }
 0x1a4   :  { %v438_v40 = vsel %vm428_vm4, nan, %v437_v38  ;;  %v602_v41 = vsel %vm428_vm4, nan, %v601_v39 }
 0x1a5   :  { %v439_v26 = vmul.f32 %v438_v40, %v1006_v14  ;;  %v603_v29 = vmul.f32 %v602_v41, %v447_v33 }
 0x1a7   :  { %604 = vst [vmem:[#allocation11 + $0x8] sm:$0xff] %v603_v29 }
 0x1a8   :  { %440 = vst [vmem:[#allocation11] sm:$0xff] %v439_v26 }
 0x1a9   :  { %615 = dma.vmem_to_hbm [thread:$0]  %s611_s12, 256, %s613_s29, [#allocation4]  }
 0x1aa   :  { %881 = dma.done.wait [#allocation4], 256  }
 0x1ab   :  { %882 = vsyncadd [#allocation4], 4294967040 }
 0x1ac   :  { %883 = dma.done.wait [#allocation13], 256  }
 0x1ad   :  { %884 = vsyncadd [#allocation13], 4294967040 }
 0x1ae   :  { %650 = vsyncpa [#allocation3], 1 }
 0x1af   :  { %651 = vsyncpa [#allocation6], 1 }
 0x1b0   :  { %652 = vsyncpa [#allocation9], 1 }
 0x1b1   :  { %653 = vsyncpa [#allocation4], 1 }
 0x1b2   :  { %654 = vsyncpa [#allocation13], 1 }

</bundles_post_ra>
